<compile_context>
chip_gen: v7x
topology: tpu7x:2x2x1
jax: 0.10.0
libtpu: 0.0.40
codegen_flags: <defaults>
</compile_context>

<pallas_src>
import functools
import math

import numpy as np
import jax
import jax.numpy as jnp
from jax.experimental import pallas as pl
from jax.experimental.pallas import tpu as pltpu


def _round_up(x, m):
    return (x + m - 1) // m * m


def _cdiv(a, b):
    return (a + b - 1) // b


# ----------------------------------------------------------------------------
# Pallas kernel: whole ButterflyLRLinear forward for a tile of rows.
# ----------------------------------------------------------------------------
def _bflylr_kernel(x_ref, coef_ref, w1g_ref, w2_ref, bfb_ref, bias_ref, gb_ref,
                   o_ref, y_ref, *, log_n, n, n_pad, n_stacks, rank, rpad):
    x = x_ref[...].astype(jnp.float32)              # (TN, n)
    width = y_ref.shape[1]                          # n_stacks * n_pad (multiple of 128)
    out_pad = o_ref.shape[1]                        # lane-dense output width
    L = log_n

    def stage_rows(idx):
        a = coef_ref[idx:idx + 1, :]                          # (1, width) self coeff
        b = coef_ref[L + idx:L + idx + 1, :]                  # (1, width) partner coeff
        m = coef_ref[2 * L + idx:2 * L + idx + 1, :] > 0.5    # (1, width) partner is +stride
        return a, b, m

    if n == n_pad:
        # n >= 128: fuse stage 0 with the stack replication.  The stride-1 partner of
        # x is identical for every stack, so compute it once on the n-wide input and
        # write each stack's stage-0 output straight into its 128-aligned segment.
        hi0 = pltpu.roll(x, n - 1, axis=1)          # hi0[k] = x[(k + 1) % n]
        lo0 = pltpu.roll(x, 1, axis=1)              # lo0[k] = x[(k - 1) % n]
        m0 = coef_ref[2 * L:2 * L + 1, :n] > 0.5    # same bit-0 pattern for all stacks
        partner0 = jnp.where(m0, hi0, lo0)
        for s in range(n_stacks):
            a0 = coef_ref[0:1, s * n:(s + 1) * n]
            b0 = coef_ref[L:L + 1, s * n:(s + 1) * n]
            y_ref[:, s * n:(s + 1) * n] = a0 * x + b0 * partner0
        start = 1
    else:
        # Tiny-n path (n < 128): plain replication into zero-padded 128-wide segments.
        y_ref[...] = jnp.zeros(y_ref.shape, jnp.float32)
        for s in range(n_stacks):
            y_ref[:, s * n_pad:s * n_pad + n] = x
        start = 0

    # Remaining butterfly stages (increasing stride):
    #   y[k] <- a[k]*y[k] + b[k]*partner[k],  partner[k] = y[k XOR stride]
    # realised as two XLU lane rolls + one select + 2 mul + 1 add (VPU).
    # Coefficients are zero wherever a roll would wrap across a segment boundary.
    y = None
    for idx in range(start, L):
        stride = 1 << idx
        cur = y_ref[...]
        hi = pltpu.roll(cur, width - stride, axis=1)   # cur[(k + stride) % width]
        lo = pltpu.roll(cur, stride, axis=1)           # cur[(k - stride) % width]
        a, b, m = stage_rows(idx)
        y = a * cur + b * jnp.where(m, hi, lo)
        if idx < L - 1:
            y_ref[...] = y                             # last stage is consumed directly
    if y is None:                                      # degenerate log_n == start
        y = y_ref[...]

    bf = y[:, :out_pad] + bfb_ref[...]                 # butterfly output + its bias

    # Low-rank branch; the gate projection is fused as column `rank` of the
    # (in, rpad) weight.  Its row of w2 is zero so it never leaks into lr.
    h = jnp.dot(x, w1g_ref[...], preferred_element_type=jnp.float32)    # (TN, rpad)
    lr = jnp.dot(h, w2_ref[...], preferred_element_type=jnp.float32)    # (TN, out_pad)

    gate_col = jax.lax.broadcasted_iota(jnp.int32, (1, rpad), 1) == rank
    glin = jnp.sum(jnp.where(gate_col, h, 0.0), axis=1, keepdims=True) + gb_ref[0]
    g = jax.nn.sigmoid(glin)                          # (TN, 1)

    # torch.lerp(bf, lr, g) + bias in one expression; single lane-dense store.
    o_ref[...] = (bf + g * (lr - bf) + bias_ref[...]).astype(o_ref.dtype)


# ----------------------------------------------------------------------------
# Host-side: packed per-stage butterfly coefficients on the padded lane width.
# twiddle: (nstacks, nblocks=1, log_n, n//2, 2, 2), increasing_stride=True.
# Returns a (3*log_n, width) array with rows [A | B | mask] such that per stage
#   y_new[k] = A[k]*y[k] + B[k]*(y[k+stride] if mask[k] else y[k-stride]).
# ----------------------------------------------------------------------------
def _butterfly_stage_operands(twiddle, seg, width):
    tw = np.asarray(twiddle, np.float32)
    S, _, L, half, _, _ = tw.shape
    n = 2 * half
    coef = np.zeros((3 * L, width), np.float32)
    A, B, M = coef[:L], coef[L:2 * L], coef[2 * L:]
    for s in range(S):
        base = s * seg
        for idx in range(L):
            stride = 1 << idx
            tv = tw[s, 0, idx].reshape(n // (2 * stride), stride, 2, 2)
            for k in range(n):
                i, j, p = k // (2 * stride), k % stride, (k // stride) % 2
                A[idx, base + k] = tv[i, j, p, p]           # self coefficient
                B[idx, base + k] = tv[i, j, p, 1 - p]       # partner coefficient
                M[idx, base + k] = 1.0 - p                  # 1 -> partner at k+stride
    return coef


# ----------------------------------------------------------------------------
# Per-generation row-tile / VMEM-limit selection.
# ----------------------------------------------------------------------------
def _choose_tiling(N, in_features, width, out_pad, fixed_bytes, block_rows):
    kind = ""
    try:
        kind = jax.devices()[0].device_kind.lower()
    except Exception:
        pass
    if "v7" in kind:          # 64 MiB physical VMEM per TensorCore
        tn_cap, vmem_limit = 448, 56 << 20
    elif "v6" in kind:        # 128 MiB physical, 32 MiB scoped default
        tn_cap, vmem_limit = 1024, 100 << 20
    elif "v5" in kind:        # 128x128 MXU, 16 MiB scoped default, 1 vst slot
        tn_cap, vmem_limit = 256, 96 << 20
    else:
        tn_cap, vmem_limit = 256, 64 << 20
    if block_rows is not None:
        tn_cap = min(tn_cap, max(8, _round_up(block_rows, 8)))

    # Per-row working set: 2x x block + 2x out block (double buffered) + y scratch
    # + one full-width temp for the last butterfly stage (conservative).
    per_row = 4 * (2 * in_features + 2 * out_pad + 2 * width)
    budget = int(vmem_limit * 0.8) - fixed_bytes
    tn_fit = max(8, (budget // per_row) // 8 * 8) if budget > 8 * per_row else 8

    tn = int(min(tn_cap, tn_fit, _round_up(N, 8)))
    tn = max(8, tn // 8 * 8)

    if "v7" in kind:          # keep both TensorCores busy: >= 2 (and even) grid steps
        steps = _cdiv(N, tn)
        if steps == 1 and N > 8:
            steps = 2
        elif steps > 1 and steps % 2 == 1:
            steps += 1
        tn = max(8, _round_up(_cdiv(N, steps), 8))
    return tn, vmem_limit


# ----------------------------------------------------------------------------
# Wrapper: layout plumbing + pallas_call.
# ----------------------------------------------------------------------------
def butterfly_lr_linear(x, params, *, block_rows=None):
    """x: (N, in_features) f32 rows. Returns (N, out_features) f32."""
    N, in_features = x.shape
    out_features = params["bias"].shape[0]
    rank = params["lr_w1"].shape[0]
    tw = params["twiddle"]
    n_stacks, _, log_n, half, _, _ = tw.shape
    n = 2 * half
    assert n == in_features, "power-of-two in_features expected (see make_params)"
    assert out_features <= n_stacks * n

    n_pad = _round_up(n, 128)                 # 128-aligned per-stack segment
    width = n_stacks * n_pad                  # butterfly working width (lane dense)
    # Padded column of output column c (identity whenever n >= 128).
    pcol = (np.arange(out_features) // n) * n_pad + (np.arange(out_features) % n)
    out_pad = _round_up(int(pcol[-1]) + 1, 128)   # lane-dense kernel output width
    rpad = _round_up(rank + 1, 128)               # unmasked K dim for the 2nd matmul

    f32 = np.float32
    coef = _butterfly_stage_operands(tw, n_pad, width)           # (3*log_n, width)
    # Fused low-rank-1 + gate weight: (in, rpad); column `rank` is the gate.
    w1g = np.zeros((in_features, rpad), f32)
    w1g[:, :rank] = np.asarray(params["lr_w1"], f32).T
    w1g[:, rank] = np.asarray(params["gate_w"], f32)[0]
    # Second projection, gate/padding rows zero, columns remapped to padded layout.
    w2 = np.zeros((rpad, out_pad), f32)
    w2[:rank, pcol] = np.asarray(params["lr_w2"], f32).T
    bfb = np.zeros((1, out_pad), f32)
    bfb[0, pcol] = np.asarray(params["bf_bias"], f32)
    bias = np.zeros((1, out_pad), f32)
    bias[0, pcol] = np.asarray(params["bias"], f32)
    gb = np.asarray(params["gate_b"], f32).reshape(1)            # scalar -> SMEM

    coef, w1g, w2, bfb, bias, gb = map(jnp.asarray, (coef, w1g, w2, bfb, bias, gb))

    fixed_bytes = (4 * 2 * (coef.size + w1g.size + w2.size + bfb.size + bias.size)
                   + (2 << 20))               # grid-resident operands + margin
    tn, vmem_limit = _choose_tiling(N, in_features, width, out_pad,
                                    fixed_bytes, block_rows)

    n_rows = _round_up(N, tn)
    if n_rows != N:
        x = jnp.pad(x, ((0, n_rows - N), (0, 0)))

    def full2d(arr):                          # whole-array, grid-resident operand
        return pl.BlockSpec(arr.shape, lambda i: (0, 0))

    kernel = functools.partial(_bflylr_kernel, log_n=log_n, n=n, n_pad=n_pad,
                               n_stacks=n_stacks, rank=rank, rpad=rpad)

    flops = n_rows * (2 * in_features * rpad + 2 * rpad * out_pad
                      + 4 * log_n * width + 6 * out_pad)
    # Coefficients / weights are VMEM-resident: count them once, not per step.
    bytes_accessed = 4 * (n_rows * (in_features + out_pad) + coef.size + w1g.size
                          + w2.size + bfb.size + bias.size + 1)

    out_full = pl.pallas_call(
        kernel,
        out_shape=jax.ShapeDtypeStruct((n_rows, out_pad), x.dtype),
        grid=(n_rows // tn,),
        in_specs=[
            pl.BlockSpec((tn, in_features), lambda i: (i, 0)),
            full2d(coef), full2d(w1g), full2d(w2), full2d(bfb), full2d(bias),
            pl.BlockSpec(memory_space=pltpu.MemorySpace.SMEM),
        ],
        out_specs=pl.BlockSpec((tn, out_pad), lambda i: (i, 0)),
        scratch_shapes=[pltpu.VMEM((tn, width), jnp.float32)],
        compiler_params=pltpu.CompilerParams(
            dimension_semantics=("parallel",),
            vmem_limit_bytes=int(vmem_limit)),
        cost_estimate=pl.CostEstimate(flops=int(flops),
                                      transcendentals=int(n_rows),
                                      bytes_accessed=int(bytes_accessed)),
    )(x, coef, w1g, w2, bfb, bias, gb)

    out_full = out_full[:N]
    if n_pad == n:                            # production path: plain slice
        return out_full[:, :out_features]
    return jnp.take(out_full, jnp.asarray(pcol), axis=1)   # tiny-n path (toy shapes)


# ----------------------------------------------------------------------------
# Deterministic parameter construction (shapes from the module __init__).
# ----------------------------------------------------------------------------
def make_params(key, in_features, out_features, rank):
    # TODO(synk): in_features that are not a power of two would need the Butterfly
    # zero-padding path; this synthetic kernel asserts power-of-two.
    assert in_features & (in_features - 1) == 0
    log_n = int(math.ceil(math.log2(in_features)))
    n = 1 << log_n
    nstacks = int(math.ceil(out_features / n))
    ks = jax.random.split(key, 7)

    twiddle = jax.random.normal(
        ks[0], (nstacks, 1, log_n, n // 2, 2, 2), jnp.float32) / math.sqrt(2.0)
    b_in = 1.0 / math.sqrt(in_features)
    b_rk = 1.0 / math.sqrt(rank)
    b_out = 1.0 / math.sqrt(out_features)
    return dict(
        twiddle=twiddle,
        bf_bias=jax.random.uniform(ks[1], (out_features,), jnp.float32, -b_in, b_in),
        lr_w1=jax.random.uniform(ks[2], (rank, in_features), jnp.float32, -b_in, b_in),
        lr_w2=jax.random.uniform(ks[3], (out_features, rank), jnp.float32, -b_rk, b_rk),
        gate_w=jax.random.uniform(ks[4], (1, in_features), jnp.float32, -b_in, b_in),
        gate_b=jax.random.uniform(ks[5], (1,), jnp.float32, -b_in, b_in),
        bias=jax.random.uniform(ks[6], (out_features,), jnp.float32, -b_out, b_out),
    )


# ----------------------------------------------------------------------------
# Pure-JAX reference (mirrors the PyTorch forward, incl. torch_butterfly math).
# ----------------------------------------------------------------------------
def reference_forward(x, params):
    tw = params["twiddle"]
    S, _, L, half, _, _ = tw.shape
    n = 2 * half
    B = x.shape[0]
    out_features = params["bias"].shape[0]

    out = jnp.broadcast_to(x[:, None, :], (B, S, n))
    for idx in range(L):                                      # increasing_stride
        stride = 1 << idx
        t = tw[:, 0, idx].reshape(S, n // (2 * stride), stride, 2, 2)
        t = jnp.transpose(t, (0, 1, 3, 4, 2))                 # (S, n/2s, 2, 2, s)
        orr = out.reshape(B, S, n // (2 * stride), 1, 2, stride)
        out = (t[None] * orr).sum(axis=4).reshape(B, S, n)
    bf = out.reshape(B, S * n)[:, :out_features] + params["bf_bias"]

    lr = (x @ params["lr_w1"].T) @ params["lr_w2"].T
    g = jax.nn.sigmoid(x @ params["gate_w"].T + params["gate_b"])
    return bf + g * (lr - bf) + params["bias"]


if __name__ == "__main__":
    key = jax.random.PRNGKey(0)
    kp, kx, kp2, kx2 = jax.random.split(key, 4)

    # --- Test 1: module-scale toy shapes (n < 128 gather path, single grid step).
    in_features, out_features, rank = 32, 64, 8
    batch, seq = 2, 8
    params = make_params(kp, in_features, out_features, rank)
    x3 = jax.random.normal(kx, (batch, seq, in_features), jnp.float32)
    x = x3.reshape(-1, in_features)                           # (16, 32) rows

    out = jax.block_until_ready(butterfly_lr_linear(x, params))
    ref = reference_forward(x, params)
    np.testing.assert_allclose(np.asarray(out), np.asarray(ref),
                               rtol=1e-3, atol=1e-3)
    _ = out.reshape(batch, seq, out_features)                 # back to (B, S, out)

    # --- Test 2: n >= 128, n_stacks > 1, multi-step grid (fused stage-0 path).
    in2, out2, rank2 = 128, 200, 12
    params2 = make_params(kp2, in2, out2, rank2)
    x2 = jax.random.normal(kx2, (42, in2), jnp.float32)
    out2v = jax.block_until_ready(butterfly_lr_linear(x2, params2, block_rows=16))
    ref2 = reference_forward(x2, params2)
    np.testing.assert_allclose(np.asarray(out2v), np.asarray(ref2),
                               rtol=1e-3, atol=1e-3)

    print("KERNEL_OK")
</pallas_src>

<mosaic_0001>
module attributes {stable_mosaic.version = 11 : i64} {
  func.func @_bflylr_kernel(%arg0: i32, %arg1: memref<16x32xf32, #tpu.memory_space<vmem>>, %arg2: memref<15x256xf32, #tpu.memory_space<vmem>>, %arg3: memref<32x128xf32, #tpu.memory_space<vmem>>, %arg4: memref<128x256xf32, #tpu.memory_space<vmem>>, %arg5: memref<1x256xf32, #tpu.memory_space<vmem>>, %arg6: memref<1x256xf32, #tpu.memory_space<vmem>>, %arg7: memref<1xf32, #tpu.memory_space<smem>>, %arg8: memref<16x256xf32, #tpu.memory_space<vmem>>, %arg9: memref<16x256xf32, #tpu.memory_space<vmem>>) attributes {dimension_semantics = [#tpu.dimension_semantics<parallel>], iteration_bounds = array<i64: 1>, scalar_prefetch = 0 : i64, scratch_operands = 1 : i64, tpu.core_type = #tpu.core_type<tc>, window_params = [{transform_indices = @transform_0, window_bounds = array<i64: 16, 32>}, {pipeline_mode = #tpu.pipeline_mode<synchronous>, transform_indices = @transform_1, window_bounds = array<i64: 15, 256>}, {pipeline_mode = #tpu.pipeline_mode<synchronous>, transform_indices = @transform_2, window_bounds = array<i64: 32, 128>}, {pipeline_mode = #tpu.pipeline_mode<synchronous>, transform_indices = @transform_3, window_bounds = array<i64: 128, 256>}, {pipeline_mode = #tpu.pipeline_mode<synchronous>, transform_indices = @transform_4, window_bounds = array<i64: 1, 256>}, {pipeline_mode = #tpu.pipeline_mode<synchronous>, transform_indices = @transform_5, window_bounds = array<i64: 1, 256>}, {transform_indices = @transform_6, window_bounds = array<i64: 1>}, {transform_indices = @transform_7, window_bounds = array<i64: 16, 256>}]} {
    %c0 = arith.constant 0 : index
    %c0_0 = arith.constant 0 : index
    %0 = vector.load %arg1[%c0, %c0_0] : memref<16x32xf32, #tpu.memory_space<vmem>>, vector<16x32xf32>
    %cst = arith.constant 0.000000e+00 : f32
    %1 = vector.broadcast %cst : f32 to vector<16x256xf32>
    %c0_1 = arith.constant 0 : index
    %c0_2 = arith.constant 0 : index
    %2 = vector.load %arg9[%c0_1, %c0_2] : memref<16x256xf32, #tpu.memory_space<vmem>>, vector<16x256xf32>
    tpu.vector_store %arg9[%c0_1, %c0_2], %1 {strides = array<i32>} : memref<16x256xf32, #tpu.memory_space<vmem>>, vector<16x256xf32>,
    %c0_3 = arith.constant 0 : index
    %c0_4 = arith.constant 0 : index
    %3 = vector.load %arg9[%c0_3, %c0_4] : memref<16x256xf32, #tpu.memory_space<vmem>>, vector<16x32xf32>
    tpu.vector_store %arg9[%c0_3, %c0_4], %0 {strides = array<i32>} : memref<16x256xf32, #tpu.memory_space<vmem>>, vector<16x32xf32>,
    %c0_5 = arith.constant 0 : index
    %c128 = arith.constant 128 : index
    %4 = vector.load %arg9[%c0_5, %c128] : memref<16x256xf32, #tpu.memory_space<vmem>>, vector<16x32xf32>
    tpu.vector_store %arg9[%c0_5, %c128], %0 {strides = array<i32>} : memref<16x256xf32, #tpu.memory_space<vmem>>, vector<16x32xf32>,
    %c0_6 = arith.constant 0 : index
    %c0_7 = arith.constant 0 : index
    %5 = vector.load %arg9[%c0_6, %c0_7] : memref<16x256xf32, #tpu.memory_space<vmem>>, vector<16x256xf32>
    %c255_i32 = arith.constant 255 : i32
    %6 = tpu.dynamic_rotate %5 by %c255_i32 dim 1 : vector<16x256xf32>, i32 -> vector<16x256xf32>
    %c1_i32 = arith.constant 1 : i32
    %7 = tpu.dynamic_rotate %5 by %c1_i32 dim 1 : vector<16x256xf32>, i32 -> vector<16x256xf32>
    %c0_8 = arith.constant 0 : index
    %c0_9 = arith.constant 0 : index
    %8 = vector.load %arg2[%c0_8, %c0_9] : memref<15x256xf32, #tpu.memory_space<vmem>>, vector<1x256xf32>
    %c5 = arith.constant 5 : index
    %c0_10 = arith.constant 0 : index
    %9 = vector.load %arg2[%c5, %c0_10] : memref<15x256xf32, #tpu.memory_space<vmem>>, vector<1x256xf32>
    %c10 = arith.constant 10 : index
    %c0_11 = arith.constant 0 : index
    %10 = vector.load %arg2[%c10, %c0_11] : memref<15x256xf32, #tpu.memory_space<vmem>>, vector<1x256xf32>
    %cst_12 = arith.constant 5.000000e-01 : f32
    %11 = vector.broadcast %cst_12 : f32 to vector<1x256xf32>
    %12 = arith.cmpf ogt, %10, %11 : vector<1x256xf32>
    %13 = vector.broadcast %8 : vector<1x256xf32> to vector<16x256xf32>
    %14 = arith.mulf %13, %5 : vector<16x256xf32>
    %15 = vector.shape_cast %12 : vector<1x256xi1> to vector<1x256xi1>
    %16 = vector.broadcast %15 : vector<1x256xi1> to vector<16x256xi1>
    %17 = arith.select %16, %6, %7 : vector<16x256xi1>, vector<16x256xf32>
    %18 = vector.broadcast %9 : vector<1x256xf32> to vector<16x256xf32>
    %19 = arith.mulf %18, %17 : vector<16x256xf32>
    %20 = arith.addf %14, %19 : vector<16x256xf32>
    %c0_13 = arith.constant 0 : index
    %c0_14 = arith.constant 0 : index
    %21 = vector.load %arg9[%c0_13, %c0_14] : memref<16x256xf32, #tpu.memory_space<vmem>>, vector<16x256xf32>
    tpu.vector_store %arg9[%c0_13, %c0_14], %20 {strides = array<i32>} : memref<16x256xf32, #tpu.memory_space<vmem>>, vector<16x256xf32>,
    %c0_15 = arith.constant 0 : index
    %c0_16 = arith.constant 0 : index
    %22 = vector.load %arg9[%c0_15, %c0_16] : memref<16x256xf32, #tpu.memory_space<vmem>>, vector<16x256xf32>
    %c254_i32 = arith.constant 254 : i32
    %23 = tpu.dynamic_rotate %22 by %c254_i32 dim 1 : vector<16x256xf32>, i32 -> vector<16x256xf32>
    %c2_i32 = arith.constant 2 : i32
    %24 = tpu.dynamic_rotate %22 by %c2_i32 dim 1 : vector<16x256xf32>, i32 -> vector<16x256xf32>
    %c1 = arith.constant 1 : index
    %c0_17 = arith.constant 0 : index
    %25 = vector.load %arg2[%c1, %c0_17] : memref<15x256xf32, #tpu.memory_space<vmem>>, vector<1x256xf32>
    %c6 = arith.constant 6 : index
    %c0_18 = arith.constant 0 : index
    %26 = vector.load %arg2[%c6, %c0_18] : memref<15x256xf32, #tpu.memory_space<vmem>>, vector<1x256xf32>
    %c11 = arith.constant 11 : index
    %c0_19 = arith.constant 0 : index
    %27 = vector.load %arg2[%c11, %c0_19] : memref<15x256xf32, #tpu.memory_space<vmem>>, vector<1x256xf32>
    %cst_20 = arith.constant 5.000000e-01 : f32
    %28 = vector.broadcast %cst_20 : f32 to vector<1x256xf32>
    %29 = arith.cmpf ogt, %27, %28 : vector<1x256xf32>
    %30 = vector.broadcast %25 : vector<1x256xf32> to vector<16x256xf32>
    %31 = arith.mulf %30, %22 : vector<16x256xf32>
    %32 = vector.shape_cast %29 : vector<1x256xi1> to vector<1x256xi1>
    %33 = vector.broadcast %32 : vector<1x256xi1> to vector<16x256xi1>
    %34 = arith.select %33, %23, %24 : vector<16x256xi1>, vector<16x256xf32>
    %35 = vector.broadcast %26 : vector<1x256xf32> to vector<16x256xf32>
    %36 = arith.mulf %35, %34 : vector<16x256xf32>
    %37 = arith.addf %31, %36 : vector<16x256xf32>
    %c0_21 = arith.constant 0 : index
    %c0_22 = arith.constant 0 : index
    %38 = vector.load %arg9[%c0_21, %c0_22] : memref<16x256xf32, #tpu.memory_space<vmem>>, vector<16x256xf32>
    tpu.vector_store %arg9[%c0_21, %c0_22], %37 {strides = array<i32>} : memref<16x256xf32, #tpu.memory_space<vmem>>, vector<16x256xf32>,
    %c0_23 = arith.constant 0 : index
    %c0_24 = arith.constant 0 : index
    %39 = vector.load %arg9[%c0_23, %c0_24] : memref<16x256xf32, #tpu.memory_space<vmem>>, vector<16x256xf32>
    %c252_i32 = arith.constant 252 : i32
    %40 = tpu.dynamic_rotate %39 by %c252_i32 dim 1 : vector<16x256xf32>, i32 -> vector<16x256xf32>
    %c4_i32 = arith.constant 4 : i32
    %41 = tpu.dynamic_rotate %39 by %c4_i32 dim 1 : vector<16x256xf32>, i32 -> vector<16x256xf32>
    %c2 = arith.constant 2 : index
    %c0_25 = arith.constant 0 : index
    %42 = vector.load %arg2[%c2, %c0_25] : memref<15x256xf32, #tpu.memory_space<vmem>>, vector<1x256xf32>
    %c7 = arith.constant 7 : index
    %c0_26 = arith.constant 0 : index
    %43 = vector.load %arg2[%c7, %c0_26] : memref<15x256xf32, #tpu.memory_space<vmem>>, vector<1x256xf32>
    %c12 = arith.constant 12 : index
    %c0_27 = arith.constant 0 : index
    %44 = vector.load %arg2[%c12, %c0_27] : memref<15x256xf32, #tpu.memory_space<vmem>>, vector<1x256xf32>
    %cst_28 = arith.constant 5.000000e-01 : f32
    %45 = vector.broadcast %cst_28 : f32 to vector<1x256xf32>
    %46 = arith.cmpf ogt, %44, %45 : vector<1x256xf32>
    %47 = vector.broadcast %42 : vector<1x256xf32> to vector<16x256xf32>
    %48 = arith.mulf %47, %39 : vector<16x256xf32>
    %49 = vector.shape_cast %46 : vector<1x256xi1> to vector<1x256xi1>
    %50 = vector.broadcast %49 : vector<1x256xi1> to vector<16x256xi1>
    %51 = arith.select %50, %40, %41 : vector<16x256xi1>, vector<16x256xf32>
    %52 = vector.broadcast %43 : vector<1x256xf32> to vector<16x256xf32>
    %53 = arith.mulf %52, %51 : vector<16x256xf32>
    %54 = arith.addf %48, %53 : vector<16x256xf32>
    %c0_29 = arith.constant 0 : index
    %c0_30 = arith.constant 0 : index
    %55 = vector.load %arg9[%c0_29, %c0_30] : memref<16x256xf32, #tpu.memory_space<vmem>>, vector<16x256xf32>
    tpu.vector_store %arg9[%c0_29, %c0_30], %54 {strides = array<i32>} : memref<16x256xf32, #tpu.memory_space<vmem>>, vector<16x256xf32>,
    %c0_31 = arith.constant 0 : index
    %c0_32 = arith.constant 0 : index
    %56 = vector.load %arg9[%c0_31, %c0_32] : memref<16x256xf32, #tpu.memory_space<vmem>>, vector<16x256xf32>
    %c248_i32 = arith.constant 248 : i32
    %57 = tpu.dynamic_rotate %56 by %c248_i32 dim 1 : vector<16x256xf32>, i32 -> vector<16x256xf32>
    %c8_i32 = arith.constant 8 : i32
    %58 = tpu.dynamic_rotate %56 by %c8_i32 dim 1 : vector<16x256xf32>, i32 -> vector<16x256xf32>
    %c3 = arith.constant 3 : index
    %c0_33 = arith.constant 0 : index
    %59 = vector.load %arg2[%c3, %c0_33] : memref<15x256xf32, #tpu.memory_space<vmem>>, vector<1x256xf32>
    %c8 = arith.constant 8 : index
    %c0_34 = arith.constant 0 : index
    %60 = vector.load %arg2[%c8, %c0_34] : memref<15x256xf32, #tpu.memory_space<vmem>>, vector<1x256xf32>
    %c13 = arith.constant 13 : index
    %c0_35 = arith.constant 0 : index
    %61 = vector.load %arg2[%c13, %c0_35] : memref<15x256xf32, #tpu.memory_space<vmem>>, vector<1x256xf32>
    %cst_36 = arith.constant 5.000000e-01 : f32
    %62 = vector.broadcast %cst_36 : f32 to vector<1x256xf32>
    %63 = arith.cmpf ogt, %61, %62 : vector<1x256xf32>
    %64 = vector.broadcast %59 : vector<1x256xf32> to vector<16x256xf32>
    %65 = arith.mulf %64, %56 : vector<16x256xf32>
    %66 = vector.shape_cast %63 : vector<1x256xi1> to vector<1x256xi1>
    %67 = vector.broadcast %66 : vector<1x256xi1> to vector<16x256xi1>
    %68 = arith.select %67, %57, %58 : vector<16x256xi1>, vector<16x256xf32>
    %69 = vector.broadcast %60 : vector<1x256xf32> to vector<16x256xf32>
    %70 = arith.mulf %69, %68 : vector<16x256xf32>
    %71 = arith.addf %65, %70 : vector<16x256xf32>
    %c0_37 = arith.constant 0 : index
    %c0_38 = arith.constant 0 : index
    %72 = vector.load %arg9[%c0_37, %c0_38] : memref<16x256xf32, #tpu.memory_space<vmem>>, vector<16x256xf32>
    tpu.vector_store %arg9[%c0_37, %c0_38], %71 {strides = array<i32>} : memref<16x256xf32, #tpu.memory_space<vmem>>, vector<16x256xf32>,
    %c0_39 = arith.constant 0 : index
    %c0_40 = arith.constant 0 : index
    %73 = vector.load %arg9[%c0_39, %c0_40] : memref<16x256xf32, #tpu.memory_space<vmem>>, vector<16x256xf32>
    %c240_i32 = arith.constant 240 : i32
    %74 = tpu.dynamic_rotate %73 by %c240_i32 dim 1 : vector<16x256xf32>, i32 -> vector<16x256xf32>
    %c16_i32 = arith.constant 16 : i32
    %75 = tpu.dynamic_rotate %73 by %c16_i32 dim 1 : vector<16x256xf32>, i32 -> vector<16x256xf32>
    %c4 = arith.constant 4 : index
    %c0_41 = arith.constant 0 : index
    %76 = vector.load %arg2[%c4, %c0_41] : memref<15x256xf32, #tpu.memory_space<vmem>>, vector<1x256xf32>
    %c9 = arith.constant 9 : index
    %c0_42 = arith.constant 0 : index
    %77 = vector.load %arg2[%c9, %c0_42] : memref<15x256xf32, #tpu.memory_space<vmem>>, vector<1x256xf32>
    %c14 = arith.constant 14 : index
    %c0_43 = arith.constant 0 : index
    %78 = vector.load %arg2[%c14, %c0_43] : memref<15x256xf32, #tpu.memory_space<vmem>>, vector<1x256xf32>
    %cst_44 = arith.constant 5.000000e-01 : f32
    %79 = vector.broadcast %cst_44 : f32 to vector<1x256xf32>
    %80 = arith.cmpf ogt, %78, %79 : vector<1x256xf32>
    %81 = vector.broadcast %76 : vector<1x256xf32> to vector<16x256xf32>
    %82 = arith.mulf %81, %73 : vector<16x256xf32>
    %83 = vector.shape_cast %80 : vector<1x256xi1> to vector<1x256xi1>
    %84 = vector.broadcast %83 : vector<1x256xi1> to vector<16x256xi1>
    %85 = arith.select %84, %74, %75 : vector<16x256xi1>, vector<16x256xf32>
    %86 = vector.broadcast %77 : vector<1x256xf32> to vector<16x256xf32>
    %87 = arith.mulf %86, %85 : vector<16x256xf32>
    %88 = arith.addf %82, %87 : vector<16x256xf32>
    %c0_45 = arith.constant 0 : index
    %c0_46 = arith.constant 0 : index
    %89 = vector.load %arg5[%c0_45, %c0_46] : memref<1x256xf32, #tpu.memory_space<vmem>>, vector<1x256xf32>
    %90 = vector.broadcast %89 : vector<1x256xf32> to vector<16x256xf32>
    %91 = arith.addf %88, %90 : vector<16x256xf32>
    %c0_47 = arith.constant 0 : index
    %c0_48 = arith.constant 0 : index
    %92 = vector.load %arg3[%c0_47, %c0_48] : memref<32x128xf32, #tpu.memory_space<vmem>>, vector<32x128xf32>
    %cst_49 = arith.constant dense<0.000000e+00> : vector<16x128xf32>
    %93 = tpu.matmul %0, %92, %cst_49 {dimension_numbers = #tpu.dot_dimension_numbers<[1], [0], [0], [1], [0, 0, 1, 1], [], []>} : vector<16x32xf32>, vector<32x128xf32>, vector<16x128xf32> -> vector<16x128xf32>
    %c0_50 = arith.constant 0 : index
    %c0_51 = arith.constant 0 : index
    %94 = vector.load %arg4[%c0_50, %c0_51] : memref<128x256xf32, #tpu.memory_space<vmem>>, vector<128x256xf32>
    %cst_52 = arith.constant dense<0.000000e+00> : vector<16x256xf32>
    %95 = tpu.matmul %93, %94, %cst_52 {dimension_numbers = #tpu.dot_dimension_numbers<[1], [0], [0], [1], [0, 0, 1, 1], [], []>} : vector<16x128xf32>, vector<128x256xf32>, vector<16x256xf32> -> vector<16x256xf32>
    %96 = tpu.iota {dimensions = array<i32: 1>} : vector<1x128xi32>
    %c8_i32_53 = arith.constant 8 : i32
    %97 = vector.broadcast %c8_i32_53 : i32 to vector<1x128xi32>
    %98 = arith.cmpi eq, %96, %97 : vector<1x128xi32>
    %cst_54 = arith.constant 0.000000e+00 : f32
    %99 = vector.shape_cast %98 : vector<1x128xi1> to vector<1x128xi1>
    %100 = vector.broadcast %99 : vector<1x128xi1> to vector<16x128xi1>
    %101 = vector.broadcast %cst_54 : f32 to vector<16x128xf32>
    %102 = arith.select %100, %93, %101 : vector<16x128xi1>, vector<16x128xf32>
    %cst_55 = arith.constant dense<0.000000e+00> : vector<16xf32>
    %103 = vector.multi_reduction <add>, %102, %cst_55 [1] : vector<16x128xf32> to vector<16xf32>
    %104 = vector.shape_cast %103 : vector<16xf32> to vector<16x1xf32>
    %c0_56 = arith.constant 0 : index
    %105 = memref.load %arg7[%c0_56] : memref<1xf32, #tpu.memory_space<smem>>
    %106 = vector.broadcast %105 : f32 to vector<16x1xf32>
    %107 = arith.addf %104, %106 : vector<16x1xf32>
    %108 = arith.negf %107 : vector<16x1xf32>
    %109 = math.exp %108 : vector<16x1xf32>
    %cst_57 = arith.constant 1.000000e+00 : f32
    %110 = vector.broadcast %cst_57 : f32 to vector<16x1xf32>
    %111 = arith.addf %110, %109 : vector<16x1xf32>
    %112 = arith.divf %110, %111 : vector<16x1xf32>
    %113 = arith.subf %95, %91 : vector<16x256xf32>
    %114 = vector.broadcast %112 : vector<16x1xf32> to vector<16x256xf32>
    %115 = arith.mulf %114, %113 : vector<16x256xf32>
    %116 = arith.addf %91, %115 : vector<16x256xf32>
    %c0_58 = arith.constant 0 : index
    %c0_59 = arith.constant 0 : index
    %117 = vector.load %arg6[%c0_58, %c0_59] : memref<1x256xf32, #tpu.memory_space<vmem>>, vector<1x256xf32>
    %118 = vector.broadcast %117 : vector<1x256xf32> to vector<16x256xf32>
    %119 = arith.addf %116, %118 : vector<16x256xf32>
    %c0_60 = arith.constant 0 : index
    %c0_61 = arith.constant 0 : index
    %120 = vector.load %arg8[%c0_60, %c0_61] : memref<16x256xf32, #tpu.memory_space<vmem>>, vector<16x256xf32>
    tpu.vector_store %arg8[%c0_60, %c0_61], %119 {strides = array<i32>} : memref<16x256xf32, #tpu.memory_space<vmem>>, vector<16x256xf32>,
    return
  }
  func.func @transform_0(%arg0: i32) -> (i32, i32) {
    %c0_i32 = arith.constant 0 : i32
    %c0_i32_0 = arith.constant 0 : i32
    return %arg0, %c0_i32 : i32, i32
  }
  func.func @transform_1(%arg0: i32) -> (i32, i32) {
    %c0_i32 = arith.constant 0 : i32
    %c0_i32_0 = arith.constant 0 : i32
    %c0_i32_1 = arith.constant 0 : i32
    return %c0_i32, %c0_i32_0 : i32, i32
  }
  func.func @transform_2(%arg0: i32) -> (i32, i32) {
    %c0_i32 = arith.constant 0 : i32
    %c0_i32_0 = arith.constant 0 : i32
    %c0_i32_1 = arith.constant 0 : i32
    return %c0_i32, %c0_i32_0 : i32, i32
  }
  func.func @transform_3(%arg0: i32) -> (i32, i32) {
    %c0_i32 = arith.constant 0 : i32
    %c0_i32_0 = arith.constant 0 : i32
    %c0_i32_1 = arith.constant 0 : i32
    return %c0_i32, %c0_i32_0 : i32, i32
  }
  func.func @transform_4(%arg0: i32) -> (i32, i32) {
    %c0_i32 = arith.constant 0 : i32
    %c0_i32_0 = arith.constant 0 : i32
    %c0_i32_1 = arith.constant 0 : i32
    return %c0_i32, %c0_i32_0 : i32, i32
  }
  func.func @transform_5(%arg0: i32) -> (i32, i32) {
    %c0_i32 = arith.constant 0 : i32
    %c0_i32_0 = arith.constant 0 : i32
    %c0_i32_1 = arith.constant 0 : i32
    return %c0_i32, %c0_i32_0 : i32, i32
  }
  func.func @transform_6(%arg0: i32) -> i32 {
    %c0_i32 = arith.constant 0 : i32
    %c0_i32_0 = arith.constant 0 : i32
    return %c0_i32 : i32
  }
  func.func @transform_7(%arg0: i32) -> (i32, i32) {
    %c0_i32 = arith.constant 0 : i32
    %c0_i32_0 = arith.constant 0 : i32
    return %arg0, %c0_i32 : i32, i32
  }
}

</mosaic_0001>

<bundles_post_ra>
// kernel: tpu_custom_call.1
= control target key start
LH: loop header
LB: loop body
LE: loop exit
PB: predicated region body
PF: predicated region fallthrough
CT: control target
= control target key end

     0   :  { %13 = vsyncpa [#allocation5], 0  ;;  %s1498_s0 = inlined_call_operand.hbm [shape: f32[16,32], index: 0, kind: input, shape index: {}]   ;;  %s1499_s1 = inlined_call_operand.hbm [shape: f32[15,256], index: 1, kind: input, shape index: {}]   ;;  %s1500_s2 = inlined_call_operand.hbm [shape: f32[32,128], index: 2, kind: input, shape index: {}]   ;;  %s1501_s3 = inlined_call_operand.hbm [shape: f32[128,256], index: 3, kind: input, shape index: {}]   ;;  %s1502_s4 = inlined_call_operand.hbm [shape: f32[1,256], index: 4, kind: input, shape index: {}]   ;;  %s1503_s5 = inlined_call_operand.hbm [shape: f32[1,256], index: 5, kind: input, shape index: {}]   ;;  %s1504_s6 = inlined_call_operand.<no memory space> [shape: f32[1], index: 6, kind: input, shape index: {}]   ;;  %s1505_s7 = inlined_call_operand.hbm [shape: f32[16,256], index: 7, kind: output, shape index: {}]  }
   0x1   :  { %14 = vsyncpa [#allocation8], 0 }
   0x2   :  { %15 = vsyncpa [#allocation11], 0 }
   0x3   :  { %16 = vsyncpa [#allocation14], 0 }
   0x4   :  { %17 = vsyncpa [#allocation6], 0  ;;  %s1105_s24 = smov [#allocation7]   ;;  %s941_s28 = scalar_lea.hbm %s1499_s1, 512 }
   0x5   :  { %s35_s25 = sshll.u32 %s1105_s24, 4  ;;  %p942_p0 = scmp.ne.s32.totalorder %s1499_s1, %s941_s28  ;;  %s36_s25 = int_to_ptr.vmem [resolvable:$true] %s35_s25 }
   0x6   :  { %p945_p1 = scmp.lt.u32.totalorder %s941_s28, %s1499_s1 }
   0x8   :  { %p947_p2 = pnand %p945_p1, %p942_p0 }
   0xa   :  { %950 = shalt.err (!%p947_p2)
}
   0xb   :  { %s951_s10 = scalar_lea.vmem %s36_s25, 512  ;;  %p956_p4 = scmp.lt.s32.totalorder %s36_s25, %s36_s25 }
   0xc   :  { %p952_p3 = scmp.ne.s32.totalorder %s36_s25, %s951_s10  ;;  %p957_p5 = scmp.lt.s32.totalorder %s951_s10, %s951_s10 }
   0xe   :  { %p958_p6 = por %p957_p5, %p956_p4 }
  0x10   :  { %p959_p7 = pnand %p958_p6, %p952_p3 }
  0x12   :  { %962 = shalt.err (!%p959_p7)
}
  0x13   :  { %s1106_s11 = smov 256   ;;  %s1107_s12 = smov 16  }
  0x14   :  { %41 = dma.hbm_to_vmem [thread:$0]  %s1499_s1, 512, %s36_s25, [#allocation8], %s1106_s11, %s1106_s11, %s1107_s12  }
  0x15   :  { %s1108_s15 = smov [#allocation10]   ;;  %s1109_s17 = smov [#allocation4]  }
  0x16   :  { %s59_s16 = sshll.u32 %s1108_s15, 4  ;;  %s23_s18 = sshll.u32 %s1109_s17, 4  ;;  %s60_s16 = int_to_ptr.vmem [resolvable:$true] %s59_s16  ;;  %s24_s18 = int_to_ptr.vmem [resolvable:$true] %s23_s18 }
  0x17   :  { %s963_s21 = scalar_lea.hbm %s1501_s3, 4096 }
  0x18   :  { %p964_p8 = scmp.ne.s32.totalorder %s1501_s3, %s963_s21  ;;  %p967_p9 = scmp.lt.u32.totalorder %s963_s21, %s1501_s3 }
  0x1a   :  { %p969_p10 = pnand %p967_p9, %p964_p8 }
  0x1c   :  { %972 = shalt.err (!%p969_p10)
}
  0x1d   :  { %s973_s1 = scalar_lea.vmem %s60_s16, 4096  ;;  %p978_p12 = scmp.lt.s32.totalorder %s60_s16, %s60_s16 }
  0x1e   :  { %p974_p11 = scmp.ne.s32.totalorder %s60_s16, %s973_s1  ;;  %p979_p13 = scmp.lt.s32.totalorder %s973_s1, %s973_s1 }
  0x20   :  { %p980_p0 = por %p979_p13, %p978_p12 }
  0x22   :  { %p981_p1 = pnand %p980_p0, %p974_p11 }
  0x24   :  { %984 = shalt.err (!%p981_p1)
}
  0x25   :  { %65 = dma.hbm_to_vmem [thread:$0]  %s1501_s3, 4096, %s60_s16, [#allocation11], %s1106_s11, %s1106_s11, %s1107_s12  }
  0x26   :  { %s985_s30 = scalar_lea.hbm %s1498_s0, 256 }
  0x27   :  { %p986_p2 = scmp.ne.s32.totalorder %s1498_s0, %s985_s30  ;;  %p989_p3 = scmp.lt.u32.totalorder %s985_s30, %s1498_s0 }
  0x29   :  { %p991_p4 = pnand %p989_p3, %p986_p2 }
  0x2b   :  { %994 = shalt.err (!%p991_p4)
}
  0x2c   :  { %s995_s14 = scalar_lea.vmem %s24_s18, 256  ;;  %p1000_p6 = scmp.lt.s32.totalorder %s24_s18, %s24_s18 }
  0x2d   :  { %p996_p5 = scmp.ne.s32.totalorder %s24_s18, %s995_s14  ;;  %p1001_p7 = scmp.lt.s32.totalorder %s995_s14, %s995_s14 }
  0x2f   :  { %p1002_p8 = por %p1001_p7, %p1000_p6 }
  0x31   :  { %p1003_p9 = pnand %p1002_p8, %p996_p5 }
  0x33   :  { %1006 = shalt.err (!%p1003_p9)
}
  0x34   :  { %s1110_s3 = smov 128   ;;  %s1111_s15 = smov 8  }
  0x35   :  { %29 = dma.hbm_to_vmem [thread:$0]  %s1498_s0, 256, %s24_s18, [#allocation5], %s1110_s3, %s1110_s3, %s1111_s15  }
  0x36   :  { %s1112_s19 = smov [#allocation9]   ;;  %s1113_s21 = smov [#allocation12]  }
  0x37   :  { %s47_s20 = sshll.u32 %s1112_s19, 4  ;;  %s72_s22 = sshll.u32 %s1113_s21, 4  ;;  %s48_s20 = int_to_ptr.vmem [resolvable:$true] %s47_s20  ;;  %s73_s22 = int_to_ptr.vmem [resolvable:$true] %s72_s22 }
  0x38   :  { %s1007_s26 = scalar_lea.hbm %s1500_s2, 512 }
  0x39   :  { %p1008_p10 = scmp.ne.s32.totalorder %s1500_s2, %s1007_s26  ;;  %p1011_p11 = scmp.lt.u32.totalorder %s1007_s26, %s1500_s2 }
  0x3b   :  { %p1013_p12 = pnand %p1011_p11, %p1008_p10 }
  0x3d   :  { %1016 = shalt.err (!%p1013_p12)
}
  0x3e   :  { %s1017_s0 = scalar_lea.vmem %s48_s20, 512  ;;  %p1022_p0 = scmp.lt.s32.totalorder %s48_s20, %s48_s20 }
  0x3f   :  { %p1018_p13 = scmp.ne.s32.totalorder %s48_s20, %s1017_s0  ;;  %p1023_p1 = scmp.lt.s32.totalorder %s1017_s0, %s1017_s0 }
  0x41   :  { %p1024_p2 = por %p1023_p1, %p1022_p0 }
  0x43   :  { %p1025_p3 = pnand %p1024_p2, %p1018_p13 }
  0x45   :  { %1028 = shalt.err (!%p1025_p3)
}
  0x46   :  { %53 = dma.hbm_to_vmem [thread:$0]  %s1500_s2, 512, %s48_s20, [#allocation8], %s1110_s3, %s1110_s3, %s1111_s15  }
  0x47   :  { %s1029_s9 = scalar_lea.hbm %s1502_s4, 32 }
  0x48   :  { %p1030_p4 = scmp.ne.s32.totalorder %s1502_s4, %s1029_s9  ;;  %p1033_p5 = scmp.lt.u32.totalorder %s1029_s9, %s1502_s4 }
  0x4a   :  { %p1035_p6 = pnand %p1033_p5, %p1030_p4 }
  0x4c   :  { %1038 = shalt.err (!%p1035_p6)
}
  0x4d   :  { %s1039_s17 = scalar_lea.vmem %s73_s22, 32  ;;  %p1044_p8 = scmp.lt.s32.totalorder %s73_s22, %s73_s22 }
  0x4e   :  { %p1040_p7 = scmp.ne.s32.totalorder %s73_s22, %s1039_s17  ;;  %p1045_p9 = scmp.lt.s32.totalorder %s1039_s17, %s1039_s17 }
  0x50   :  { %p1046_p10 = por %p1045_p9, %p1044_p8 }
  0x52   :  { %p1047_p11 = pnand %p1046_p10, %p1040_p7 }
  0x54   :  { %1050 = shalt.err (!%p1047_p11)
}
  0x55   :  { %75 = dma.hbm_to_vmem [thread:$0]  %s1502_s4, 32, %s73_s22, [#allocation11]  }
  0x56   :  { %s1114_s19 = smov [#allocation13]   ;;  %s1051_s24 = scalar_lea.hbm %s1503_s5, 32 }
  0x57   :  { %s82_s20 = sshll.u32 %s1114_s19, 4  ;;  %p1052_p12 = scmp.ne.s32.totalorder %s1503_s5, %s1051_s24  ;;  %s83_s20 = int_to_ptr.vmem [resolvable:$true] %s82_s20 }
  0x58   :  { %p1055_p13 = scmp.lt.u32.totalorder %s1051_s24, %s1503_s5 }
  0x5a   :  { %p1057_p0 = pnand %p1055_p13, %p1052_p12 }
  0x5c   :  { %1060 = shalt.err (!%p1057_p0)
}
  0x5d   :  { %s1061_s28 = scalar_lea.vmem %s83_s20, 32  ;;  %p1066_p2 = scmp.lt.s32.totalorder %s83_s20, %s83_s20 }
  0x5e   :  { %p1062_p1 = scmp.ne.s32.totalorder %s83_s20, %s1061_s28  ;;  %p1067_p3 = scmp.lt.s32.totalorder %s1061_s28, %s1061_s28 }
  0x60   :  { %p1068_p4 = por %p1067_p3, %p1066_p2 }
  0x62   :  { %p1069_p5 = pnand %p1068_p4, %p1062_p1 }
  0x64   :  { %1072 = shalt.err (!%p1069_p5)
}
  0x65   :  { %85 = dma.hbm_to_vmem [thread:$0]  %s1503_s5, 32, %s83_s20, [#allocation14]  }
  0x66   :  { %1095 = dma.done.wait [#allocation5], 256  }
  0x67   :  { %1096 = vsyncadd [#allocation5], 4294967040 }
  0x68   :  { %1097 = dma.done.wait [#allocation8], 1024  }
  0x69   :  { %1098 = vsyncadd [#allocation8], 4294966272 }
  0x6a   :  { %1099 = dma.done.wait [#allocation11], 4128  }
  0x6b   :  { %1100 = vsyncadd [#allocation11], 4294963168 }
  0x6c   :  { %1101 = dma.done.wait [#allocation14], 32  }
  0x6d   :  { %1102 = vsyncadd [#allocation14], 4294967264  ;;  %v1115_v0 = vmov 0.0   ;;  %vm112_vm0 = vcmask 261120   ;;  %v106_v1 = vld [vmem:[#allocation4] sm:$0xff]  ;;  %v107_v2 = vld [vmem:[#allocation4 + $0x8] sm:$0xff]  ;;  %v129_v13 = vlaneseq }
  0x6e   :  { %109 = vst [vmem:[#allocation2 + $0x8] sm:$0xff] %v1115_v0  ;;  %108 = vst [vmem:[#allocation2] sm:$0xff] %v1115_v0  ;;  %761 = vmatprep.mubr.f32.mxu1 %v1115_v0  ;;  %869 = vmatprep.mubr.msk.f32.mxu0 %vm112_vm0, %v106_v1  ;;  %s1116_s5 = smov 127   ;;  %s1117_s0 = smov 1   ;;  %v580_v7 = vld [vmem:[#allocation9] sm:$0xff]  ;;  %v581_v8 = vld [vmem:[#allocation9 + $0x8] sm:$0xff] }
  0x6f   :  { %110 = vst [vmem:[#allocation2 + $0x10] sm:$0xff] %v1115_v0  ;;  %111 = vst [vmem:[#allocation2 + $0x18] sm:$0xff] %v1115_v0  ;;  %v872_v9 = vpack.c.bf16 %v581_v8, %v580_v7  ;;  %v582_v10 = vld [vmem:[#allocation9 + $0x10] sm:$0xff]  ;;  %v583_v11 = vld [vmem:[#allocation9 + $0x18] sm:$0xff]  ;;  %v157_v15 = vshrl.u32 %v129_v13, 7  ;;  %v1118_v23 = vmov 0  }
  0x70   :  { %115 = vst.msk [vmem:[#allocation2 + $0x8] sm:$0xff] %vm112_vm0, %v106_v1  ;;  %113 = vst.msk [vmem:[#allocation2] sm:$0xff] %vm112_vm0, %v106_v1  ;;  %v876_v12 = vpack.c.bf16 %v583_v11, %v582_v10  ;;  %v153_v14 = vld [vmem:[#allocation7 + $0x12] ss:$8 sm:$0x3]  ;;  %v1270_v25 = vand.u32 127, %v129_v13 }
  0x71   :  { %116 = vst.msk [vmem:[#allocation2 + $0x18] sm:$0xff] %vm112_vm0, %v107_v2  ;;  %114 = vst.msk [vmem:[#allocation2 + $0x10] sm:$0xff] %vm112_vm0, %v107_v2  ;;  %873 = vmatprep.subr.bf16.mxu0 %v872_v9  ;;  %vm154_vm1 = vcmp.gt.f32.partialorder %v153_v14, 0.5  ;;  %v1265_v18 = vsub.s32 1, %v157_v15  ;;  %v1267_v19 = vsub.s32 0, %v157_v15  ;;  %s1119_s18 = smov 126  }
  0x72   :  { %875 = vmatpush3.bf16.msra.mxu0 %v872_v9  ;;  %v149_v20 = vld [vmem:[#allocation7] ss:$8 sm:$0x3]  ;;  %v170_v24 = vsel %vm154_vm1, 1, %v1118_v23  ;;  %vm131_vm2 = vcmp.lt.s32.totalorder %v1270_v25, 127  ;;  %vm144_vm3 = vcmp.lt.s32.totalorder %v1270_v25, 1 }
  0x73   :  { %877 = vmatprep.subr.bf16.mxu0 %v876_v12  ;;  %v159_v26 = vrot.slane %v149_v20, %v1267_v19  ;;  %v151_v27 = vld [vmem:[#allocation7 + $0x5] ss:$8 sm:$0x3]  ;;  %v174_v28 = vrot.slane %v170_v24, %v1267_v19  ;;  %v178_v29 = vrot.slane %v170_v24, %v1265_v18  ;;  %v163_v32 = vrot.slane %v149_v20, %v1265_v18  ;;  %s1120_s29 = smov 2   ;;  %s1121_s30 = smov 124   ;;  %v688_v15 = vld [vmem:[#allocation10 + $0xb8] sm:$0xff] }
  0x74   :  { %v189_v33 = vrot.slane %v151_v27, %v1267_v19  ;;  %v193_v34 = vrot.slane %v151_v27, %v1265_v18  ;;  %v243_v63 = vld [vmem:[#allocation7 + $0x13] ss:$8 sm:$0x3]  ;;  %v241_v11 = vld [vmem:[#allocation7 + $0x6] ss:$8 sm:$0x3] }
  0x75   :  { %vm1280_vm4 = vcmp.eq.s32.totalorder %v174_v28, 1  ;;  %vm1284_vm5 = vcmp.eq.s32.totalorder %v178_v29, 1  ;;  %vm244_vm6 = vcmp.gt.f32.partialorder %v243_v63, 0.5  ;;  %vm220_vm7 = vcmp.lt.s32.totalorder %v1270_v25, 126  ;;  %s1122_s8 = smov 4   ;;  %v673_v63 = vld [vmem:[#allocation10 + $0x40] sm:$0xff] }
  0x76   :  { %879 = vmatpush3.bf16.msra.mxu0 %v876_v12  ;;  %vm233_vm8 = vcmp.lt.s32.totalorder %v1270_v25, 2  ;;  %v686_v14 = vld [vmem:[#allocation10 + $0xa8] sm:$0xff]  ;;  %vm310_vm12 = vcmp.lt.s32.totalorder %v1270_v25, 124  ;;  %vm323_vm13 = vcmp.lt.s32.totalorder %v1270_v25, 4  ;;  %s1123_s9 = smov 120  }
  0x77   :  { %v1256_v3 = vld [vmem:[#allocation2 + $0x8] sm:$0xff]  ;;  %v117_v4 = vld [vmem:[#allocation2] sm:$0xff] }
  0x78   :  { %125 = vrot.lane.b32.xlu1 %v1256_v3, %s1116_s5  ;;  %121 = vrot.lane.b32.xlu0 %v117_v4, %s1116_s5  ;;  %v1259_v5 = vld [vmem:[#allocation2 + $0x18] sm:$0xff]  ;;  %v119_v6 = vld [vmem:[#allocation2 + $0x10] sm:$0xff]  ;;  %v166_v35 = vmul.f32 %v159_v26, %v117_v4  ;;  %v167_v55 = vmul.f32 %v163_v32, %v1256_v3 }
  0x79   :  { %870 = vmatmul.mubr.msk.f32.vlgmr.msra.gmra.mrb[0].mxu0 %vm112_vm0, %v107_v2  ;;  %v168_v36 = vmul.f32 %v159_v26, %v119_v6  ;;  %v169_v56 = vmul.f32 %v163_v32, %v1259_v5  ;;  %vm774_vm0 = vcmp.eq.s32.totalorder %v1270_v25, 8 }
  0x7c   :  { %127 = vrot.lane.b32.xlu1 %v1259_v5, %s1116_s5  ;;  %123 = vrot.lane.b32.xlu0 %v119_v6, %s1116_s5 }
  0x80   :  { %138 = vrot.lane.b32.xlu1 %v119_v6, %s1117_s0  ;;  %136 = vrot.lane.b32.xlu0 %v117_v4, %s1117_s0  ;;  %v239_v6 = vld [vmem:[#allocation7 + $0x1] ss:$8 sm:$0x3] }
  0x81   :  { %v249_v12 = vrot.slane %v239_v6, %v1267_v19  ;;  %v253_v13 = vrot.slane %v239_v6, %v1265_v18  ;;  %v677_v6 = vld [vmem:[#allocation10 + $0x60] sm:$0xff] }
  0x84   :  { %142 = vrot.lane.b32.xlu1 %v1259_v5, %s1117_s0  ;;  %140 = vrot.lane.b32.xlu0 %v1256_v3, %s1117_s0  ;;  %v260_v5 = vsel %vm244_vm6, 1, %v1118_v23 }
  0x85   :  { %v264_v7 = vrot.slane %v260_v5, %v1267_v19  ;;  %v268_v8 = vrot.slane %v260_v5, %v1265_v18 }
  0x87   :  { %vm1313_vm9 = vcmp.eq.s32.totalorder %v264_v7, 1  ;;  %vm1317_vm10 = vcmp.eq.s32.totalorder %v268_v8, 1  ;;  %v679_v7 = vld [vmem:[#allocation10 + $0x70] sm:$0xff]  ;;  %v682_v8 = vld [vmem:[#allocation10 + $0x88] sm:$0xff] }
  0xea   :  { %v126_v16 = vpop.permute.xlu1 %125  ;;  %v122_v17 = vpop.permute.xlu0 %121 }
  0xeb   :  { %v132_v39 = vsel %vm131_vm2, %v122_v17, %v126_v16  ;;  %v134_v40 = vsel %vm131_vm2, %v126_v16, %v122_v17  ;;  %v279_v16 = vrot.slane %v241_v11, %v1267_v19  ;;  %v283_v17 = vrot.slane %v241_v11, %v1265_v18 }
  0xee   :  { %v128_v21 = vpop.permute.xlu1 %127  ;;  %v124_v22 = vpop.permute.xlu0 %123 }
  0xef   :  { %v133_v41 = vsel %vm131_vm2, %v124_v22, %v128_v21  ;;  %v135_v42 = vsel %vm131_vm2, %v128_v21, %v124_v22  ;;  %vm400_vm2 = vcmp.lt.s32.totalorder %v1270_v25, 120 }
  0xf2   :  { %v139_v30 = vpop.permute.xlu1 %138  ;;  %v137_v31 = vpop.permute.xlu0 %136 }
  0xf6   :  { %v143_v43 = vpop.permute.xlu1 %142  ;;  %v141_v44 = vpop.permute.xlu0 %140 }
  0xf7   :  { %v146_v45 = vsel %vm144_vm3, %v139_v30, %v143_v43  ;;  %v148_v46 = vsel %vm144_vm3, %v143_v43, %v139_v30  ;;  %v145_v47 = vsel %vm144_vm3, %v137_v31, %v141_v44  ;;  %v147_v48 = vsel %vm144_vm3, %v141_v44, %v137_v31 }
  0xf8   :  { %v183_v49 = vsel %vm1280_vm4, %v133_v41, %v148_v46  ;;  %v184_v50 = vsel %vm1284_vm5, %v135_v42, %v146_v45  ;;  %v181_v51 = vsel %vm1280_vm4, %v132_v39, %v147_v48  ;;  %v182_v52 = vsel %vm1284_vm5, %v134_v40, %v145_v47  ;;  %v666_v48 = vld [vmem:[#allocation10 + $0x8] sm:$0xff] }
  0xf9   :  { %v198_v53 = vmul.f32 %v189_v33, %v183_v49  ;;  %v196_v54 = vmul.f32 %v189_v33, %v181_v51  ;;  %v199_v57 = vmul.f32 %v193_v34, %v184_v50  ;;  %v197_v59 = vmul.f32 %v193_v34, %v182_v52  ;;  %v668_v49 = vld [vmem:[#allocation10 + $0x18] sm:$0xff]  ;;  %v665_v51 = vld [vmem:[#allocation10] sm:$0xff]  ;;  %v667_v52 = vld [vmem:[#allocation10 + $0x10] sm:$0xff] }
  0xfa   :  { %v880_v50 = vpack.c.bf16 %v668_v49, %v666_v48  ;;  %v329_v49 = vld [vmem:[#allocation7 + $0x2] ss:$8 sm:$0x3]  ;;  %vm413_vm3 = vcmp.lt.s32.totalorder %v1270_v25, 8 }
  0xfb   :  { %v202_v58 = vadd.f32 %v198_v53, %v168_v36  ;;  %v200_v60 = vadd.f32 %v196_v54, %v166_v35  ;;  %v203_v61 = vadd.f32 %v199_v57, %v169_v56  ;;  %v201_v62 = vadd.f32 %v197_v59, %v167_v55  ;;  %v670_v53 = vld [vmem:[#allocation10 + $0x28] sm:$0xff]  ;;  %v672_v55 = vld [vmem:[#allocation10 + $0x38] sm:$0xff]  ;;  %v669_v56 = vld [vmem:[#allocation10 + $0x20] sm:$0xff] }
  0xfc   :  { %v882_v54 = vpack.c.bf16 %v667_v52, %v665_v51  ;;  %v671_v57 = vld [vmem:[#allocation10 + $0x30] sm:$0xff]  ;;  %881 = vmatprep.subr.bf16.mxu1 %v880_v50  ;;  %v674_v59 = vld [vmem:[#allocation10 + $0x48] sm:$0xff] }
  0xfd   :  { %214 = vrot.lane.b32.xlu1 %v202_v58, %s1119_s18  ;;  %212 = vrot.lane.b32.xlu0 %v200_v60, %s1119_s18  ;;  %v258_v36 = vmul.f32 %v249_v12, %v202_v58  ;;  %v256_v37 = vmul.f32 %v249_v12, %v200_v60  ;;  %v259_v44 = vmul.f32 %v253_v13, %v203_v61  ;;  %v681_v12 = vld [vmem:[#allocation10 + $0x80] sm:$0xff] }
  0xfe   :  { %v257_v45 = vmul.f32 %v253_v13, %v201_v62  ;;  %883 = vmatpush1.bf16.msra.mxu1 %v882_v54  ;;  %v683_v13 = vld [vmem:[#allocation10 + $0x90] sm:$0xff]  ;;  %v331_v54 = vld [vmem:[#allocation7 + $0x7] ss:$8 sm:$0x3] }
 0x101   :  { %218 = vrot.lane.b32.xlu1 %v203_v61, %s1119_s18  ;;  %216 = vrot.lane.b32.xlu0 %v201_v62, %s1119_s18 }
 0x105   :  { %227 = vrot.lane.b32.xlu1 %v202_v58, %s1120_s29  ;;  %225 = vrot.lane.b32.xlu0 %v200_v60, %s1120_s29  ;;  %v884_v58 = vpack.c.bf16 %v672_v55, %v670_v53  ;;  %v676_v60 = vld [vmem:[#allocation10 + $0x58] sm:$0xff]  ;;  %v343_v55 = vrot.slane %v329_v49, %v1265_v18 }
 0x107   :  { %885 = vmatprep.subr.bf16.mxu1 %v884_v58  ;;  %v369_v58 = vrot.slane %v331_v54, %v1267_v19 }
 0x109   :  { %231 = vrot.lane.b32.xlu1 %v203_v61, %s1120_s29  ;;  %229 = vrot.lane.b32.xlu0 %v201_v62, %s1120_s29  ;;  %v886_v61 = vpack.c.bf16 %v671_v57, %v669_v56  ;;  %v888_v62 = vpack.c.bf16 %v676_v60, %v674_v59  ;;  %v373_v59 = vrot.slane %v331_v54, %v1265_v18 }
 0x10b   :  { %887 = vmatpush1.bf16.msra.mxu1 %v886_v61 }
 0x10c   :  { %889 = vmatprep.subr.bf16.mxu1 %v888_v62 }
 0x16f   :  { %v215_v1 = vpop.permute.xlu1 %214  ;;  %v213_v2 = vpop.permute.xlu0 %212 }
 0x173   :  { %v219_v3 = vpop.permute.xlu1 %218  ;;  %v217_v4 = vpop.permute.xlu0 %216 }
 0x174   :  { %v222_v20 = vsel %vm220_vm7, %v215_v1, %v219_v3  ;;  %v224_v21 = vsel %vm220_vm7, %v219_v3, %v215_v1  ;;  %v221_v22 = vsel %vm220_vm7, %v213_v2, %v217_v4  ;;  %v223_v24 = vsel %vm220_vm7, %v217_v4, %v213_v2  ;;  %v675_v1 = vld [vmem:[#allocation10 + $0x50] sm:$0xff]  ;;  %v678_v2 = vld [vmem:[#allocation10 + $0x68] sm:$0xff]  ;;  %v680_v3 = vld [vmem:[#allocation10 + $0x78] sm:$0xff] }
 0x175   :  { %v890_v4 = vpack.c.bf16 %v675_v1, %v673_v63  ;;  %v892_v5 = vpack.c.bf16 %v680_v3, %v678_v2  ;;  %vm490_vm7 = vcmp.lt.s32.totalorder %v1270_v25, 112 }
 0x177   :  { %v228_v9 = vpop.permute.xlu1 %227  ;;  %v226_v10 = vpop.permute.xlu0 %225  ;;  %891 = vmatpush1.bf16.msra.mxu1 %v890_v4 }
 0x178   :  { %893 = vmatprep.subr.bf16.mxu1 %v892_v5 }
 0x17b   :  { %v232_v26 = vpop.permute.xlu1 %231  ;;  %v230_v27 = vpop.permute.xlu0 %229 }
 0x17c   :  { %v235_v28 = vsel %vm233_vm8, %v228_v9, %v232_v26  ;;  %v237_v29 = vsel %vm233_vm8, %v232_v26, %v228_v9  ;;  %v234_v30 = vsel %vm233_vm8, %v226_v10, %v230_v27  ;;  %v236_v31 = vsel %vm233_vm8, %v230_v27, %v226_v10  ;;  %v684_v9 = vld [vmem:[#allocation10 + $0x98] sm:$0xff] }
 0x17d   :  { %v273_v32 = vsel %vm1313_vm9, %v222_v20, %v237_v29  ;;  %v274_v33 = vsel %vm1317_vm10, %v224_v21, %v235_v28  ;;  %v271_v34 = vsel %vm1313_vm9, %v221_v22, %v236_v31  ;;  %v272_v35 = vsel %vm1317_vm10, %v223_v24, %v234_v30  ;;  %v685_v20 = vld [vmem:[#allocation10 + $0xa0] sm:$0xff]  ;;  %v687_v21 = vld [vmem:[#allocation10 + $0xb0] sm:$0xff]  ;;  %v690_v22 = vld [vmem:[#allocation10 + $0xc8] sm:$0xff] }
 0x17e   :  { %v288_v38 = vmul.f32 %v279_v16, %v273_v32  ;;  %v286_v39 = vmul.f32 %v279_v16, %v271_v34  ;;  %v289_v40 = vmul.f32 %v283_v17, %v274_v33  ;;  %v287_v42 = vmul.f32 %v283_v17, %v272_v35  ;;  %v692_v24 = vld [vmem:[#allocation10 + $0xd8] sm:$0xff]  ;;  %v689_v28 = vld [vmem:[#allocation10 + $0xc0] sm:$0xff]  ;;  %v691_v29 = vld [vmem:[#allocation10 + $0xd0] sm:$0xff] }
 0x17f   :  { %v894_v10 = vpack.c.bf16 %v679_v7, %v677_v6  ;;  %v896_v11 = vpack.c.bf16 %v684_v9, %v682_v8  ;;  %v898_v16 = vpack.c.bf16 %v683_v13, %v681_v12  ;;  %v900_v17 = vpack.c.bf16 %v688_v15, %v686_v14  ;;  %v694_v30 = vld [vmem:[#allocation10 + $0xe8] sm:$0xff]  ;;  %v696_v31 = vld [vmem:[#allocation10 + $0xf8] sm:$0xff]  ;;  %v693_v34 = vld [vmem:[#allocation10 + $0xe0] sm:$0xff] }
 0x180   :  { %v1331_v41 = vadd.f32 %v288_v38, %v258_v36  ;;  %v1333_v43 = vadd.f32 %v286_v39, %v256_v37  ;;  %v1337_v46 = vadd.f32 %v289_v40, %v259_v44  ;;  %v1339_v47 = vadd.f32 %v287_v42, %v257_v45  ;;  %v695_v35 = vld [vmem:[#allocation10 + $0xf0] sm:$0xff]  ;;  %v1347_v37 = vpop.f32.mrb[0].mxu0 }
 0x181   :  { %895 = vmatpush1.bf16.msra.mxu1 %v894_v10  ;;  %v902_v26 = vpack.c.bf16 %v687_v21, %v685_v20  ;;  %v904_v27 = vpack.c.bf16 %v692_v24, %v690_v22  ;;  %v906_v32 = vpack.c.bf16 %v691_v29, %v689_v28  ;;  %v908_v33 = vpack.c.bf16 %v696_v31, %v694_v30  ;;  %v656_v38 = vpop.f32.mrb[1].mxu0  ;;  %v333_v39 = vld [vmem:[#allocation7 + $0x14] ss:$8 sm:$0x3] }
 0x182   :  { %304 = vrot.lane.b32.xlu1 %v1331_v41, %s1121_s30  ;;  %302 = vrot.lane.b32.xlu0 %v1333_v43, %s1121_s30  ;;  %v910_v36 = vpack.c.bf16 %v695_v35, %v693_v34  ;;  %vm334_vm11 = vcmp.gt.f32.partialorder %v333_v39, 0.5  ;;  %v349_v21 = vmul.f32 %v343_v55, %v1337_v46  ;;  %v347_v22 = vmul.f32 %v343_v55, %v1339_v47  ;;  %v419_v28 = vld [vmem:[#allocation7 + $0x3] ss:$8 sm:$0x3] }
 0x183   :  { %897 = vmatprep.subr.bf16.mxu1 %v896_v11  ;;  %v350_v48 = vsel %vm334_vm11, 1, %v1118_v23  ;;  %v421_v34 = vld [vmem:[#allocation7 + $0x10] ss:$8 sm:$0x3]  ;;  %vm503_vm8 = vcmp.lt.s32.totalorder %v1270_v25, 16 }
 0x184   :  { %v354_v50 = vrot.slane %v350_v48, %v1267_v19  ;;  %v358_v51 = vrot.slane %v350_v48, %v1265_v18 }
 0x185   :  { %899 = vmatpush1.bf16.msra.mxu1 %v898_v16 }
 0x186   :  { %308 = vrot.lane.b32.xlu1 %v1337_v46, %s1121_s30  ;;  %306 = vrot.lane.b32.xlu0 %v1339_v47, %s1121_s30  ;;  %vm1358_vm14 = vcmp.eq.s32.totalorder %v354_v50, 1  ;;  %vm1362_vm15 = vcmp.eq.s32.totalorder %v358_v51, 1 }
 0x187   :  { %901 = vmatprep.subr.bf16.mxu1 %v900_v17 }
 0x189   :  { %903 = vmatpush1.bf16.msra.mxu1 %v902_v26 }
 0x18a   :  { %317 = vrot.lane.b32.xlu1 %v1331_v41, %s1122_s8  ;;  %315 = vrot.lane.b32.xlu0 %v1333_v43, %s1122_s8 }
 0x18b   :  { %905 = vmatprep.subr.bf16.mxu1 %v904_v27 }
 0x18d   :  { %907 = vmatpush1.bf16.msra.mxu1 %v906_v32  ;;  %v429_v32 = vrot.slane %v419_v28, %v1267_v19 }
 0x18e   :  { %321 = vrot.lane.b32.xlu1 %v1337_v46, %s1122_s8  ;;  %319 = vrot.lane.b32.xlu0 %v1339_v47, %s1122_s8  ;;  %v423_v46 = vld [vmem:[#allocation7 + $0x15] ss:$8 sm:$0x3] }
 0x18f   :  { %909 = vmatprep.subr.bf16.mxu1 %v908_v33  ;;  %vm424_vm1 = vcmp.gt.f32.partialorder %v423_v46, 0.5  ;;  %v433_v33 = vrot.slane %v419_v28, %v1265_v18 }
 0x190   :  { %v440_v31 = vsel %vm424_vm1, 1, %v1118_v23 }
 0x191   :  { %911 = vmatpush1.bf16.msra.mxu1 %v910_v36  ;;  %v444_v35 = vrot.slane %v440_v31, %v1267_v19  ;;  %v448_v36 = vrot.slane %v440_v31, %v1265_v18 }
 0x193   :  { %vm1395_vm4 = vcmp.eq.s32.totalorder %v444_v35, 1  ;;  %vm1399_vm5 = vcmp.eq.s32.totalorder %v448_v36, 1 }
 0x194   :  { %762 = vmatmul.mubr.f32.vlgmr.msra.gmra.mrb[0].mxu1 %v656_v38 }
 0x195   :  { %767 = vmatprep.mubr.f32.mxu1 %v1115_v0  ;;  %v339_v0 = vrot.slane %v329_v49, %v1267_v19 }
 0x197   :  { %v348_v11 = vmul.f32 %v339_v0, %v1331_v41  ;;  %v346_v12 = vmul.f32 %v339_v0, %v1333_v43  ;;  %v777_v41 = vsel %vm774_vm0, %v656_v38, 0.0  ;;  %v778_v43 = vsel %vm774_vm0, %v1347_v37, 0.0 }
 0x198   :  { %768 = vmatmul.mubr.f32.gmra.mrb[2].mxu1 %v1347_v37 }
 0x1f4   :  { %v305_v40 = vpop.permute.xlu1 %304  ;;  %v303_v42 = vpop.permute.xlu0 %302 }
 0x1f8   :  { %v309_v44 = vpop.permute.xlu1 %308  ;;  %v307_v45 = vpop.permute.xlu0 %306 }
 0x1f9   :  { %v312_v60 = vsel %vm310_vm12, %v305_v40, %v309_v44  ;;  %v314_v61 = vsel %vm310_vm12, %v309_v44, %v305_v40  ;;  %v311_v62 = vsel %vm310_vm12, %v303_v42, %v307_v45  ;;  %v313_v63 = vsel %vm310_vm12, %v307_v45, %v303_v42 }
 0x1fa   :  { %v459_v42 = vrot.slane %v421_v34, %v1267_v19  ;;  %v463_v44 = vrot.slane %v421_v34, %v1265_v18 }
 0x1fc   :  { %v318_v52 = vpop.permute.xlu1 %317  ;;  %v316_v53 = vpop.permute.xlu0 %315 }
 0x200   :  { %v322_v1 = vpop.permute.xlu1 %321  ;;  %v320_v2 = vpop.permute.xlu0 %319 }
 0x201   :  { %v325_v3 = vsel %vm323_vm13, %v318_v52, %v322_v1  ;;  %v327_v4 = vsel %vm323_vm13, %v322_v1, %v318_v52  ;;  %v324_v5 = vsel %vm323_vm13, %v316_v53, %v320_v2  ;;  %v326_v6 = vsel %vm323_vm13, %v320_v2, %v316_v53 }
 0x202   :  { %v363_v7 = vsel %vm1358_vm14, %v312_v60, %v327_v4  ;;  %v364_v8 = vsel %vm1362_vm15, %v314_v61, %v325_v3  ;;  %v361_v9 = vsel %vm1358_vm14, %v311_v62, %v326_v6  ;;  %v362_v10 = vsel %vm1362_vm15, %v313_v63, %v324_v5 }
 0x203   :  { %v378_v13 = vmul.f32 %v369_v58, %v363_v7  ;;  %v376_v14 = vmul.f32 %v369_v58, %v361_v9  ;;  %v379_v15 = vmul.f32 %v373_v59, %v364_v8  ;;  %v377_v17 = vmul.f32 %v373_v59, %v362_v10 }
 0x205   :  { %v382_v16 = vadd.f32 %v378_v13, %v348_v11  ;;  %v380_v20 = vadd.f32 %v376_v14, %v346_v12  ;;  %v383_v24 = vadd.f32 %v379_v15, %v349_v21  ;;  %v381_v26 = vadd.f32 %v377_v17, %v347_v22  ;;  %v513_v22 = vld [vmem:[#allocation7 + $0x16] ss:$8 sm:$0x3] }
 0x206   :  { %v784_v13 = vstv %s1504_s6  ;;  %vm514_vm6 = vcmp.gt.f32.partialorder %v513_v22, 0.5  ;;  %s1125_s6 = smov [#allocation15]  }
 0x207   :  { %394 = vrot.lane.b32.xlu1 %v382_v16, %s1123_s9  ;;  %392 = vrot.lane.b32.xlu0 %v380_v20, %s1123_s9  ;;  %v438_v39 = vmul.f32 %v429_v32, %v382_v16  ;;  %v436_v40 = vmul.f32 %v429_v32, %v380_v20  ;;  %v439_v45 = vmul.f32 %v433_v33, %v383_v24  ;;  %v530_v46 = vsel %vm514_vm6, 1, %v1118_v23  ;;  %v511_v32 = vld [vmem:[#allocation7 + $0x11] ss:$8 sm:$0x3]  ;;  %v564_v23 = vld [vmem:[#allocation12] sm:$0x3] }
 0x208   :  { %v437_v48 = vmul.f32 %v433_v33, %v381_v26  ;;  %v534_v33 = vrot.slane %v530_v46, %v1267_v19  ;;  %v538_v35 = vrot.slane %v530_v46, %v1265_v18  ;;  %v569_v50 = vrot.slane %v564_v23, %v1267_v19  ;;  %s836_s14 = sshll.u32 %s1125_s6, 4  ;;  %s837_s14 = int_to_ptr.vmem [resolvable:$true] %s836_s14 }
 0x209   :  { %s1073_s16 = scalar_lea.vmem %s837_s14, 512  ;;  %p1078_p7 = scmp.lt.s32.totalorder %s837_s14, %s837_s14 }
 0x20a   :  { %vm1443_vm9 = vcmp.eq.s32.totalorder %v534_v33, 1  ;;  %vm1447_vm10 = vcmp.eq.s32.totalorder %v538_v35, 1  ;;  %p1074_p6 = scmp.ne.s32.totalorder %s837_s14, %s1073_s16  ;;  %p1079_p8 = scmp.lt.s32.totalorder %s1073_s16, %s1073_s16 }
 0x20b   :  { %398 = vrot.lane.b32.xlu1 %v383_v24, %s1123_s9  ;;  %396 = vrot.lane.b32.xlu0 %v381_v26, %s1123_s9 }
 0x20c   :  { %p1080_p9 = por %p1079_p8, %p1078_p7 }
 0x20e   :  { %p1081_p10 = pnand %p1080_p9, %p1074_p6 }
 0x20f   :  { %407 = vrot.lane.b32.xlu1 %v382_v16, %s1111_s15  ;;  %405 = vrot.lane.b32.xlu0 %v380_v20, %s1111_s15 }
 0x213   :  { %411 = vrot.lane.b32.xlu1 %v383_v24, %s1111_s15  ;;  %409 = vrot.lane.b32.xlu0 %v381_v26, %s1111_s15  ;;  %s1124_s15 = smov 112  }
 0x232   :  { %779 = vadd.xlane.f32.xlu0 %v777_v41  ;;  %v509_v41 = vld [vmem:[#allocation7 + $0x4] ss:$8 sm:$0x3] }
 0x237   :  { %781 = vadd.xlane.f32.xlu1 %v778_v43 }
 0x267   :  { %v1419_v5 = vpop.f32.mrb[0].mxu1 }
 0x268   :  { %v1421_v6 = vpop.f32.mrb[1].mxu1 }
 0x26b   :  { %v1423_v11 = vpop.f32.mrb[2].mxu1 }
 0x26c   :  { %v1425_v12 = vpop.f32.mrb[3].mxu1 }
 0x279   :  { %v395_v47 = vpop.permute.xlu1 %394  ;;  %v393_v27 = vpop.permute.xlu0 %392 }
 0x27d   :  { %v399_v29 = vpop.permute.xlu1 %398  ;;  %v397_v30 = vpop.permute.xlu0 %396 }
 0x27e   :  { %v402_v51 = vsel %vm400_vm2, %v395_v47, %v399_v29  ;;  %v404_v52 = vsel %vm400_vm2, %v399_v29, %v395_v47  ;;  %v401_v53 = vsel %vm400_vm2, %v393_v27, %v397_v30  ;;  %v403_v54 = vsel %vm400_vm2, %v397_v30, %v393_v27 }
 0x27f   :  { %v519_v29 = vrot.slane %v509_v41, %v1267_v19  ;;  %v523_v30 = vrot.slane %v509_v41, %v1265_v18 }
 0x281   :  { %v408_v37 = vpop.permute.xlu1 %407  ;;  %v406_v38 = vpop.permute.xlu0 %405 }
 0x285   :  { %v412_v0 = vpop.permute.xlu1 %411  ;;  %v410_v55 = vpop.permute.xlu0 %409 }
 0x286   :  { %v415_v56 = vsel %vm413_vm3, %v408_v37, %v412_v0  ;;  %v417_v57 = vsel %vm413_vm3, %v412_v0, %v408_v37  ;;  %v414_v58 = vsel %vm413_vm3, %v406_v38, %v410_v55  ;;  %v416_v59 = vsel %vm413_vm3, %v410_v55, %v406_v38 }
 0x287   :  { %v453_v60 = vsel %vm1395_vm4, %v402_v51, %v417_v57  ;;  %v454_v61 = vsel %vm1399_vm5, %v404_v52, %v415_v56  ;;  %v451_v62 = vsel %vm1395_vm4, %v401_v53, %v416_v59  ;;  %v452_v63 = vsel %vm1399_vm5, %v403_v54, %v414_v58 }
 0x288   :  { %v468_v1 = vmul.f32 %v459_v42, %v453_v60  ;;  %v469_v2 = vmul.f32 %v463_v44, %v454_v61  ;;  %v466_v3 = vmul.f32 %v459_v42, %v451_v62  ;;  %v467_v4 = vmul.f32 %v463_v44, %v452_v63 }
 0x289   :  { %v553_v42 = vrot.slane %v511_v32, %v1265_v18  ;;  %v573_v51 = vrot.slane %v564_v23, %v1265_v18 }
 0x28a   :  { %v472_v7 = vadd.f32 %v468_v1, %v438_v39  ;;  %v473_v8 = vadd.f32 %v469_v2, %v439_v45  ;;  %v470_v9 = vadd.f32 %v466_v3, %v436_v40  ;;  %v471_v10 = vadd.f32 %v467_v4, %v437_v48 }
 0x28b   :  { %v549_v40 = vrot.slane %v511_v32, %v1267_v19 }
 0x28c   :  { %476 = vst [vmem:[#allocation2 + $0x10] sm:$0xff] %v472_v7  ;;  %477 = vst [vmem:[#allocation2 + $0x18] sm:$0xff] %v473_v8  ;;  %484 = vrot.lane.b32.xlu1 %v472_v7, %s1124_s15  ;;  %482 = vrot.lane.b32.xlu0 %v470_v9, %s1124_s15  ;;  %v528_v38 = vmul.f32 %v519_v29, %v472_v7  ;;  %v526_v39 = vmul.f32 %v519_v29, %v470_v9 }
 0x28d   :  { %474 = vst [vmem:[#allocation2] sm:$0xff] %v470_v9  ;;  %475 = vst [vmem:[#allocation2 + $0x8] sm:$0xff] %v471_v10  ;;  %v529_v44 = vmul.f32 %v523_v30, %v473_v8  ;;  %v527_v45 = vmul.f32 %v523_v30, %v471_v10 }
 0x290   :  { %488 = vrot.lane.b32.xlu1 %v473_v8, %s1124_s15  ;;  %486 = vrot.lane.b32.xlu0 %v471_v10, %s1124_s15 }
 0x294   :  { %497 = vrot.lane.b32.xlu1 %v472_v7, %s1107_s12  ;;  %495 = vrot.lane.b32.xlu0 %v470_v9, %s1107_s12 }
 0x298   :  { %501 = vrot.lane.b32.xlu1 %v473_v8, %s1107_s12  ;;  %499 = vrot.lane.b32.xlu0 %v471_v10, %s1107_s12 }
 0x2bf   :  { %v780_v14 = vpop.xlane.xlu0 %779 }
 0x2c0   :  { %v785_v16 = vadd.f32 %v784_v13, %v780_v14 }
 0x2c2   :  { %v853_v20 = vmul.f32 -1.442695, %v785_v16 }
 0x2c4   :  { %v782_v15 = vpop.xlane.xlu1 %781  ;;  %933 = vpow2.f32 %v853_v20 }
 0x2c5   :  { %v786_v17 = vadd.f32 %v784_v13, %v782_v15  ;;  %v811_v15 = vld [vmem:[#allocation13] sm:$0x3] }
 0x2c6   :  { %v820_v46 = vrot.slane %v811_v15, %v1265_v18 }
 0x2c7   :  { %v854_v21 = vmul.f32 -1.442695, %v786_v17 }
 0x2c9   :  { %935 = vpow2.f32 %v854_v21 }
 0x2ce   :  { %v934_v43 = vpop.eup %933 }
 0x2cf   :  { %v793_v31 = vadd.f32 1.0, %v934_v43  ;;  %v816_v43 = vrot.slane %v811_v15, %v1267_v19 }
 0x2d1   :  { %937 = vrcp.f32 %v793_v31 }
 0x2d3   :  { %v936_v47 = vpop.eup %935 }
 0x2d4   :  { %v794_v34 = vadd.f32 1.0, %v936_v47 }
 0x2d6   :  { %939 = vrcp.f32 %v794_v34 }
 0x2db   :  { %v938_v20 = vpop.eup %937 }
 0x2e0   :  { %v940_v21 = vpop.eup %939 }
 0x2fe   :  { %v485_v24 = vpop.permute.xlu1 %484  ;;  %v483_v26 = vpop.permute.xlu0 %482 }
 0x302   :  { %v489_v27 = vpop.permute.xlu1 %488  ;;  %v487_v28 = vpop.permute.xlu0 %486 }
 0x303   :  { %v492_v52 = vsel %vm490_vm7, %v485_v24, %v489_v27  ;;  %v494_v53 = vsel %vm490_vm7, %v489_v27, %v485_v24  ;;  %v491_v54 = vsel %vm490_vm7, %v483_v26, %v487_v28  ;;  %v493_v0 = vsel %vm490_vm7, %v487_v28, %v483_v26 }
 0x306   :  { %v498_v36 = vpop.permute.xlu1 %497  ;;  %v496_v37 = vpop.permute.xlu0 %495 }
 0x30a   :  { %v502_v55 = vpop.permute.xlu1 %501  ;;  %v500_v56 = vpop.permute.xlu0 %499 }
 0x30b   :  { %v505_v57 = vsel %vm503_vm8, %v498_v36, %v502_v55  ;;  %v507_v58 = vsel %vm503_vm8, %v502_v55, %v498_v36  ;;  %v504_v59 = vsel %vm503_vm8, %v496_v37, %v500_v56  ;;  %v506_v60 = vsel %vm503_vm8, %v500_v56, %v496_v37 }
 0x30c   :  { %v543_v61 = vsel %vm1443_vm9, %v492_v52, %v507_v58  ;;  %v544_v62 = vsel %vm1447_vm10, %v494_v53, %v505_v57  ;;  %v541_v63 = vsel %vm1443_vm9, %v491_v54, %v506_v60  ;;  %v542_v1 = vsel %vm1447_vm10, %v493_v0, %v504_v59 }
 0x30d   :  { %v558_v2 = vmul.f32 %v549_v40, %v543_v61  ;;  %v559_v3 = vmul.f32 %v553_v42, %v544_v62  ;;  %v556_v4 = vmul.f32 %v549_v40, %v541_v63  ;;  %v557_v7 = vmul.f32 %v553_v42, %v542_v1 }
 0x30f   :  { %v560_v8 = vadd.f32 %v556_v4, %v526_v39  ;;  %v561_v9 = vadd.f32 %v557_v7, %v527_v45  ;;  %v562_v25 = vadd.f32 %v558_v2, %v528_v38  ;;  %v563_v10 = vadd.f32 %v559_v3, %v529_v44 }
 0x311   :  { %v576_v13 = vadd.f32 %v569_v50, %v560_v8  ;;  %v578_v14 = vadd.f32 %v569_v50, %v562_v25  ;;  %v577_v16 = vadd.f32 %v573_v51, %v561_v9  ;;  %v579_v17 = vadd.f32 %v573_v51, %v563_v10 }
 0x313   :  { %v799_v22 = vsub.f32 %v1419_v5, %v576_v13  ;;  %v801_v24 = vsub.f32 %v1423_v11, %v578_v14  ;;  %v800_v26 = vsub.f32 %v1421_v6, %v577_v16  ;;  %v802_v41 = vsub.f32 %v1425_v12, %v579_v17 }
 0x315   :  { %v803_v47 = vmul.f32 %v938_v20, %v799_v22  ;;  %v805_v27 = vmul.f32 %v940_v21, %v801_v24  ;;  %v804_v28 = vmul.f32 %v938_v20, %v800_v26  ;;  %v806_v29 = vmul.f32 %v940_v21, %v802_v41 }
 0x317   :  { %v807_v30 = vadd.f32 %v803_v47, %v576_v13  ;;  %v809_v31 = vadd.f32 %v805_v27, %v578_v14  ;;  %v808_v32 = vadd.f32 %v804_v28, %v577_v16  ;;  %v810_v5 = vadd.f32 %v806_v29, %v579_v17 }
 0x319   :  { %v825_v33 = vadd.f32 %v816_v43, %v809_v31  ;;  %v826_v11 = vadd.f32 %v820_v46, %v810_v5  ;;  %v823_v34 = vadd.f32 %v816_v43, %v807_v30  ;;  %v824_v6 = vadd.f32 %v820_v46, %v808_v32 }
 0x31b   :  { %829 = vst [vmem:[#allocation15 + $0x10] sm:$0xff] %v825_v33  ;;  %830 = vst [vmem:[#allocation15 + $0x18] sm:$0xff] %v826_v11 }
 0x31c   :  { %827 = vst [vmem:[#allocation15] sm:$0xff] %v823_v34  ;;  %828 = vst [vmem:[#allocation15 + $0x8] sm:$0xff] %v824_v6 }
 0x31d   :  { %1084 = shalt.err (!%p1081_p10)
}
 0x31e   :  { %s1085_s3 = scalar_lea.hbm %s1505_s7, 512 }
 0x31f   :  { %p1086_p11 = scmp.ne.s32.totalorder %s1505_s7, %s1085_s3  ;;  %p1089_p12 = scmp.lt.u32.totalorder %s1085_s3, %s1505_s7 }
 0x321   :  { %p1091_p13 = pnand %p1089_p12, %p1086_p11 }
 0x323   :  { %1094 = shalt.err (!%p1091_p13)
}
 0x324   :  { %842 = dma.vmem_to_hbm [thread:$0]  %s837_s14, 512, %s1505_s7, [#allocation6], %s1106_s11, %s1106_s11, %s1107_s12  }
 0x325   :  { %1103 = dma.done.wait [#allocation6], 512  }
 0x326   :  { %1104 = vsyncadd [#allocation6], 4294966784 }
 0x327   :  { %846 = vsyncpa [#allocation5], 1 }
 0x328   :  { %847 = vsyncpa [#allocation8], 1 }
 0x329   :  { %848 = vsyncpa [#allocation11], 1 }
 0x32a   :  { %849 = vsyncpa [#allocation14], 1 }
 0x32b   :  { %850 = vsyncpa [#allocation6], 1 }

</bundles_post_ra>
